<compile_context>
chip_gen: v7x
topology: tpu7x:2x2x1
jax: 0.10.0
libtpu: 0.0.40
codegen_flags: <defaults>
</compile_context>

<pallas_src>
import jax
import jax.numpy as jnp
from jax.experimental import pallas as pl
from jax.experimental.pallas import tpu as pltpu

_LANE = 128


def _attention_kernel(h_t_ref, h_s_ref, out_ref):
    # h_t_ref: (1, tT, H), h_s_ref: (1, S, H), out_ref: (1, S, tT)
    h_t = h_t_ref[0]                       # (tT, H)
    h_s = h_s_ref[0]                       # (S, H)

    # score[i, j] = <h_s[i], h_t[j]> : contract H of both operands directly
    # (NT-form matmul, no materialized transpose), f32 accumulation on MXU.
    scores = jax.lax.dot_general(
        h_s, h_t,
        dimension_numbers=(((1,), (1,)), ((), ())),
        preferred_element_type=jnp.float32)           # (S, tT), f32

    # Softmax over the source axis (axis 0 of the (S, tT) tile == dim=1 of the
    # (B, S, T) output), numerically stabilized, all math in f32.
    m = jnp.max(scores, axis=0, keepdims=True)        # (1, tT)
    e = jnp.exp(scores - m)                           # (S, tT)
    denom = jnp.sum(e, axis=0, keepdims=True)         # (1, tT)
    inv = pl.reciprocal(denom, approx=True)           # EUP vrcp slot
    inv = inv * (2.0 - denom * inv)                   # one Newton step -> ~f32-accurate
    out_ref[0] = (e * inv).astype(out_ref.dtype)


def attention(h_t: jax.Array, h_s: jax.Array, *, t_tile: int | None = None,
              matmul_dtype="auto", out_dtype=jnp.bfloat16,
              out_buffers: int | None = None) -> jax.Array:
    """softmax(h_s @ h_t^T, axis=1)  — grid = (batch, target-tiles).

    matmul_dtype="auto": cast f32 inputs to bf16 in the wrapper (full-rate MXU,
    halved input HBM traffic); pass None to keep the input dtype.
    out_dtype defaults to bf16 — softmax outputs are in [0,1] and the (B,S,T)
    output is the dominant HBM stream; pass jnp.float32 for strict accuracy.
    """
    B, T, H = h_t.shape
    Bs, S, Hs = h_s.shape
    assert B == Bs and H == Hs, "batch / hidden dims must match"

    # Wrapper-side operand cast (halves input DMA bytes; MXU-friendly).
    if matmul_dtype == "auto":
        matmul_dtype = jnp.bfloat16 if h_t.dtype == jnp.float32 else None
    if matmul_dtype is not None:
        h_t = h_t.astype(matmul_dtype)
        h_s = h_s.astype(matmul_dtype)

    in_itemsize = jnp.dtype(h_t.dtype).itemsize
    out_itemsize = jnp.dtype(out_dtype).itemsize

    # VMEM capacity (v5e/v6e: 128 MiB, v7x: 64 MiB per TensorCore).
    try:
        vmem_cap = int(pltpu.get_tpu_info().vmem_capacity_bytes)
    except Exception:
        vmem_cap = 64 * 2**20          # conservative (v7x) fallback
    vmem_budget = int(0.75 * vmem_cap)  # ~48 MiB on v7x, ~96 MiB on v5e/v6e

    # Lane-dense target tile: generation-dependent default, a multiple of 128,
    # no bigger than needed, auto-shrunk if the VMEM budget would be exceeded.
    if t_tile is None:
        t_tile = 512 if vmem_cap >= 100 * 2**20 else 256
    tT = min(t_tile, pl.cdiv(T, _LANE) * _LANE)
    tT = max(_LANE, (tT // _LANE) * _LANE)

    n_out_bufs = out_buffers if out_buffers is not None else 2

    def _block_bytes(t):
        return (2 * t * H * in_itemsize                 # double-buffered h_t tile
                + 2 * S * H * in_itemsize               # resident h_s block (2 bufs)
                + n_out_bufs * S * t * out_itemsize     # output block buffers
                + 3 * S * t * 4)                        # f32 intermediates headroom

    while tT > _LANE and _block_bytes(tT) > vmem_budget:
        tT = max(_LANE, tT // 2)
    # TODO(synk): if _block_bytes(_LANE) still exceeds the budget (huge S*H),
    # an online-softmax over S tiles is required; not needed at these shapes.

    T_pad = pl.cdiv(T, tT) * tT
    if T_pad != T:
        # Zero-padded target columns only produce discarded (uniform 1/S)
        # output columns; the softmax over S for valid columns is unaffected.
        h_t = jnp.pad(h_t, ((0, 0), (0, T_pad - T), (0, 0)))
    n_t = T_pad // tT

    vmem_limit = int(min(vmem_budget,
                         max(32 * 2**20, _block_bytes(tT) + (4 << 20))))

    cost = pl.CostEstimate(
        flops=2 * B * S * T_pad * H,
        transcendentals=B * S * T_pad,
        bytes_accessed=(B * T_pad * H + B * S * H) * in_itemsize
        + B * S * T_pad * out_itemsize,
    )

    out_spec_kwargs = {}
    if out_buffers is not None:
        # Optional extra output buffering if writeback DMA is measured exposed.
        out_spec_kwargs["pipeline_mode"] = pl.Buffered(out_buffers)

    # On a 2-TC part (v7x), split the megacore on the batch axis so each core
    # fetches the (S, H) h_s block once per batch element (residency kept).
    dim_sem = ("parallel", "arbitrary") if B >= 2 else ("parallel", "parallel")

    out = pl.pallas_call(
        _attention_kernel,
        out_shape=jax.ShapeDtypeStruct((B, S, T_pad), out_dtype),
        grid_spec=pltpu.PrefetchScalarGridSpec(
            num_scalar_prefetch=0,
            grid=(B, n_t),
            in_specs=[
                # target tile varies with t
                pl.BlockSpec((1, tT, H), lambda b, t: (b, t, 0)),
                # source block index constant in t -> stays VMEM-resident
                pl.BlockSpec((1, S, H), lambda b, t: (b, 0, 0)),
            ],
            # FIX: t indexes the last (T_pad) axis of the (B, S, T_pad) output.
            out_specs=pl.BlockSpec((1, S, tT), lambda b, t: (b, 0, t),
                                   **out_spec_kwargs),
        ),
        compiler_params=pltpu.CompilerParams(
            dimension_semantics=dim_sem,
            vmem_limit_bytes=vmem_limit,
        ),
        cost_estimate=cost,
    )(h_t, h_s)

    if T_pad != T:
        out = out[:, :, :T]
    return out


def attention_ref(h_t: jax.Array, h_s: jax.Array) -> jax.Array:
    """Pure-JAX reference: softmax(score, dim=1), score = h_s @ h_t^T."""
    scores = jnp.einsum("bsh,bth->bst",
                        h_s.astype(jnp.float32), h_t.astype(jnp.float32))
    return jax.nn.softmax(scores, axis=1)


if __name__ == "__main__":
    key = jax.random.PRNGKey(0)
    k1, k2, k3 = jax.random.split(key, 3)

    B, T, S, H = 2, 8, 16, 32   # batch, target len, source len, hidden
    h_t = jax.random.normal(k1, (B, T, H), dtype=jnp.float32)
    h_s = jax.random.normal(k2, (B, S, H), dtype=jnp.float32)
    ref = attention_ref(h_t, h_s)

    # Default fast path: bf16 MXU operands (f32 accumulation) + bf16 output.
    out = jax.block_until_ready(attention(h_t, h_s))
    assert out.shape == (B, S, T), out.shape
    assert jnp.allclose(out.astype(jnp.float32), ref, atol=2e-2, rtol=2e-2), \
        "bf16 path mismatch vs reference"
    assert jnp.allclose(jnp.sum(out.astype(jnp.float32), axis=1), 1.0, atol=2e-2)

    # Strict f32 path (operands and output in f32).
    out_f32 = jax.block_until_ready(
        attention(h_t, h_s, matmul_dtype=None, out_dtype=jnp.float32))
    assert jnp.allclose(out_f32, ref, atol=1e-5, rtol=1e-5), \
        "f32 path mismatch vs reference"
    assert jnp.allclose(jnp.sum(out_f32, axis=1), 1.0, atol=1e-5)

    # Multi-tile target axis (T > t_tile -> n_t > 1): exercises the fixed
    # output index_map (b, 0, t).
    T2 = 300
    h_t2 = jax.random.normal(k3, (B, T2, H), dtype=jnp.float32)
    out2 = jax.block_until_ready(
        attention(h_t2, h_s, t_tile=128, matmul_dtype=None,
                  out_dtype=jnp.float32))
    ref2 = attention_ref(h_t2, h_s)
    assert out2.shape == (B, S, T2), out2.shape
    assert jnp.allclose(out2, ref2, atol=1e-5, rtol=1e-5), \
        "multi-tile path mismatch vs reference"
    assert jnp.allclose(jnp.sum(out2, axis=1), 1.0, atol=1e-5)

    print("KERNEL_OK")
</pallas_src>

<mosaic_0001>
module attributes {stable_mosaic.version = 11 : i64} {
  func.func @_attention_kernel(%arg0: i32, %arg1: i32, %arg2: memref<1x128x32xbf16, #tpu.memory_space<vmem>>, %arg3: memref<1x16x32xbf16, #tpu.memory_space<vmem>>, %arg4: memref<1x16x128xbf16, #tpu.memory_space<vmem>>) attributes {dimension_semantics = [#tpu.dimension_semantics<parallel>, #tpu.dimension_semantics<arbitrary>], iteration_bounds = array<i64: 2, 1>, scalar_prefetch = 0 : i64, scratch_operands = 0 : i64, tpu.core_type = #tpu.core_type<tc>, window_params = [{transform_indices = @transform_0, window_bounds = array<i64: 1, 128, 32>}, {transform_indices = @transform_1, window_bounds = array<i64: 1, 16, 32>}, {transform_indices = @transform_2, window_bounds = array<i64: 1, 16, 128>}]} {
    %c0 = arith.constant 0 : index
    %c0_0 = arith.constant 0 : index
    %c0_1 = arith.constant 0 : index
    %0 = vector.load %arg2[%c0, %c0_0, %c0_1] : memref<1x128x32xbf16, #tpu.memory_space<vmem>>, vector<1x128x32xbf16>
    %1 = vector.shape_cast %0 : vector<1x128x32xbf16> to vector<128x32xbf16>
    %c0_2 = arith.constant 0 : index
    %c0_3 = arith.constant 0 : index
    %c0_4 = arith.constant 0 : index
    %2 = vector.load %arg3[%c0_2, %c0_3, %c0_4] : memref<1x16x32xbf16, #tpu.memory_space<vmem>>, vector<1x16x32xbf16>
    %3 = vector.shape_cast %2 : vector<1x16x32xbf16> to vector<16x32xbf16>
    %cst = arith.constant dense<0.000000e+00> : vector<16x128xf32>
    %4 = tpu.matmul %3, %1, %cst {dimension_numbers = #tpu.dot_dimension_numbers<[1], [1], [0], [0], [0, 0, 1, 0], [], []>} : vector<16x32xbf16>, vector<128x32xbf16>, vector<16x128xf32> -> vector<16x128xf32>
    %cst_5 = arith.constant dense<0xFF800000> : vector<128xf32>
    %5 = vector.multi_reduction <maximumf>, %4, %cst_5 [0] : vector<16x128xf32> to vector<128xf32>
    %6 = vector.shape_cast %5 : vector<128xf32> to vector<1x128xf32>
    %7 = vector.broadcast %6 : vector<1x128xf32> to vector<16x128xf32>
    %8 = arith.subf %4, %7 : vector<16x128xf32>
    %9 = math.exp %8 : vector<16x128xf32>
    %cst_6 = arith.constant dense<0.000000e+00> : vector<128xf32>
    %10 = vector.multi_reduction <add>, %9, %cst_6 [0] : vector<16x128xf32> to vector<128xf32>
    %11 = vector.shape_cast %10 : vector<128xf32> to vector<1x128xf32>
    %12 = tpu.reciprocal %11 {approx = true} : vector<1x128xf32> -> vector<1x128xf32>
    %13 = arith.mulf %11, %12 : vector<1x128xf32>
    %cst_7 = arith.constant 2.000000e+00 : f32
    %14 = vector.broadcast %cst_7 : f32 to vector<1x128xf32>
    %15 = arith.subf %14, %13 : vector<1x128xf32>
    %16 = arith.mulf %12, %15 : vector<1x128xf32>
    %17 = vector.broadcast %16 : vector<1x128xf32> to vector<16x128xf32>
    %18 = arith.mulf %9, %17 : vector<16x128xf32>
    %19 = arith.truncf %18 : vector<16x128xf32> to vector<16x128xbf16>
    %c0_8 = arith.constant 0 : index
    %c0_9 = arith.constant 0 : index
    %c0_10 = arith.constant 0 : index
    %20 = vector.load %arg4[%c0_8, %c0_9, %c0_10] : memref<1x16x128xbf16, #tpu.memory_space<vmem>>, vector<1x16x128xbf16>
    %21 = vector.shape_cast %20 : vector<1x16x128xbf16> to vector<16x128xbf16>
    %22 = vector.shape_cast %19 : vector<16x128xbf16> to vector<1x16x128xbf16>
    tpu.vector_store %arg4[%c0_8, %c0_9, %c0_10], %22 {strides = array<i32>} : memref<1x16x128xbf16, #tpu.memory_space<vmem>>, vector<1x16x128xbf16>,
    return
  }
  func.func @transform_0(%arg0: i32, %arg1: i32) -> (i32, i32, i32) {
    %c0_i32 = arith.constant 0 : i32
    %c0_i32_0 = arith.constant 0 : i32
    return %arg0, %arg1, %c0_i32 : i32, i32, i32
  }
  func.func @transform_1(%arg0: i32, %arg1: i32) -> (i32, i32, i32) {
    %c0_i32 = arith.constant 0 : i32
    %c0_i32_0 = arith.constant 0 : i32
    %c0_i32_1 = arith.constant 0 : i32
    return %arg0, %c0_i32, %c0_i32_0 : i32, i32, i32
  }
  func.func @transform_2(%arg0: i32, %arg1: i32) -> (i32, i32, i32) {
    %c0_i32 = arith.constant 0 : i32
    %c0_i32_0 = arith.constant 0 : i32
    return %arg0, %c0_i32, %arg1 : i32, i32, i32
  }
}

</mosaic_0001>

<bundles_post_ra>
// kernel: tpu_custom_call.1
= control target key start
LH: loop header
LB: loop body
LE: loop exit
PB: predicated region body
PF: predicated region fallthrough
CT: control target
= control target key end

     0   :  { %7 = vsyncpa [#allocation3], 0  ;;  %s843_s0 = inlined_call_operand.vmem [shape: bf16[2,128,32], index: 0, kind: input, shape index: {}]   ;;  %s844_s1 = inlined_call_operand.vmem [shape: bf16[2,16,32], index: 1, kind: input, shape index: {}]   ;;  %s845_s2 = inlined_call_operand.hbm [shape: bf16[2,16,128], index: 2, kind: output, shape index: {}]  }
   0x1   :  { %9 = vsyncpa [#allocation3 + $0x1], 0  ;;  %s706_s9 = smov 0   ;;  %s708_s10 = smov 0  }
   0x2   :  { %s710_s11 = smov 0   ;;  %s712_s12 = smov 0  }
   0x3   :  { %s714_s13 = smov 0   ;;  %s716_s14 = smov 0  }
   0x4 LB: > { %s466_s15 = sadd.s32 4294967295, %s684_s14   ;;  %s467_s16 = sadd.s32 4294967294, %s684_s14   ;;  %s684_s14 = sphi %s716_s14, %s15_s14   ;;  %s680_s13 = sphi %s714_s13, %s852_s13   ;;  %s676_s12 = sphi %s712_s12, %s851_s12   ;;  %s672_s11 = sphi %s710_s11, %s850_s11   ;;  %s668_s10 = sphi %s708_s10, %s849_s10   ;;  %s664_s9 = sphi %s706_s9, %s848_s9  }
   0x5   : > { %s27_s17 = sadd.s32 1, %s680_s13  ;;  %s90_s18 = sadd.s32 1, %s672_s11 }
   0x6   : > { %p29_p0 = scmp.ge.s32.totalorder %s27_s17, 2  ;;  %p100_p1 = scmp.ne.s32.totalorder %s672_s11, %s668_s10 }
   0x7   : > { %p101_p2 = scmp.eq.s32.totalorder %s466_s15, 1  ;;  %p106_p3 = scmp.ne.s32.totalorder %s668_s10, %s664_s9 }
   0x8   : > { %s854_s17 = smov (%p29_p0, %s27_s17), 0  ;;  %p107_p5 = scmp.eq.s32.totalorder %s467_s16, 1 }
   0x9   : > { %p746_p4 = por %p101_p2, %p100_p1  ;;  %s85_s20 = ssub.s32 %s680_s13, %s854_s17 }
   0xa   : > { %p470_p6 = scmp.ge.s32.totalorder %s684_s14, 1  ;;  %p88_p7 = scmp.eq.s32.totalorder %s85_s20, 0 }
   0xb   : > { %p753_p8 = por %p107_p5, %p106_p3  ;;  %p146_p9 = scmp.lt.s32.totalorder %s684_s14, 3 }
   0xc   : > { %s759_s22 = scalar_select %p88_p7, %s672_s11, %s90_s18  }
   0xd   : > { %p147_p10 = pnand %p470_p6, %p146_p9 }
   0xe   : > { %p178_p11 = scmp.lt.s32.totalorder (!%p147_p10), %s676_s12, 1  ;;  %v686_v0 = vmov (!%p147_p10), 0.0   ;;  %vm687_vm0 = vmmov (!%p147_p10), 0   ;;  %vm256_vm1 = vcmask (!%p147_p10), 261120   ;;  %s174_s4 = sand.u32 (!%p147_p10), 1, %s668_s10  }
   0xf   : > { %150 = sbr.rel (%p147_p10) target bundleno = 385 (0x181), region = 28  ;;  %512 = vmatprep.subr.bf16.mxu0 (!%p147_p10), %v686_v0  ;;  %528 = vmatprep.mubr.msk.bf16.mxu0 (!%p147_p10), %vm687_vm0, %v686_v0  ;;  %s471_s5 = sshll.u32 (!%p147_p10), %s174_s4, 3 }
  0x10   : > { %s497_s6 = sshll.u32 (!%p147_p10), %s676_s12, 7  ;;  %s176_s7 = scalar_lea.vmem (!%p147_p10), [#allocation2], %s471_s5 }
  0x11   : > { %s376_s8 = sshll.u32 (!%p147_p10), %s176_s7, 4  ;;  %s793_s18 = scalar_lea.hbm (!%p147_p10), %s845_s2, %s497_s6  ;;  %s795_s8 = int_to_ptr.vmem [resolvable:$true] %s376_s8 }
  0x12   : > { %s797_s20 = scalar_lea.sflag (!%p147_p10), [#allocation3], %s174_s4 }
  0x16   : > { %s179_s23 = scalar_select %p178_p11, %s676_s12, 1 }
  0x17   : > { %s688_s12 = smov [#allocation2]  }
  0x18   : > { %s493_s24 = sshll.u32 %s179_s23, 6  ;;  %s494_s28 = sshll.u32 %s179_s23, 3 }
  0x19   : > { %s766_s27 = scalar_lea.vmem %s843_s0, %s493_s24  ;;  %s191_s3 = scalar_lea.vmem %s844_s1, %s494_s28 }
  0x1a   : > { %v591_v1 = vld [vmem:[%s766_s27] sm:$0xff]   ;;  %v592_v3 = vld [vmem:[%s766_s27 + $0x8] sm:$0xff]   ;;  %v593_v5 = vld [vmem:[%s766_s27 + $0x10] sm:$0xff]   ;;  %s606_s23 = scalar_lea.vmem %s795_s8, 128  ;;  %s610_s24 = sshll.u32 %s688_s12, 4  ;;  %s611_s24 = int_to_ptr.vmem [resolvable:$false] %s610_s24 }
  0x1b   : > { %v261_v2 = vsel %vm256_vm1, %v591_v1, 0  ;;  %v264_v4 = vsel %vm256_vm1, %v592_v3, 0  ;;  %v267_v6 = vsel %vm256_vm1, %v593_v5, 0  ;;  %v594_v7 = vld [vmem:[%s766_s27 + $0x18] sm:$0xff]   ;;  %v595_v9 = vld [vmem:[%s766_s27 + $0x20] sm:$0xff]   ;;  %v596_v11 = vld [vmem:[%s766_s27 + $0x28] sm:$0xff]   ;;  %p607_p12 = scmp.ne.s32.totalorder %s795_s8, %s606_s23  ;;  %p613_p1 = scmp.lt.s32.totalorder %s795_s8, %s611_s24 }
  0x1c   : > { %513 = vmatpush3.bf16.xpose.msra.mxu0 %v261_v2  ;;  %v270_v8 = vsel %vm256_vm1, %v594_v7, 0  ;;  %v273_v10 = vsel %vm256_vm1, %v595_v9, 0  ;;  %v276_v12 = vsel %vm256_vm1, %v596_v11, 0  ;;  %v597_v13 = vld [vmem:[%s766_s27 + $0x30] sm:$0xff]   ;;  %v598_v15 = vld [vmem:[%s766_s27 + $0x38] sm:$0xff]   ;;  %v599_v17 = vld [vmem:[%s191_s3] sm:$0xff]  }
  0x1d   : > { %514 = vmatprep.subr.bf16.mxu0 %v686_v0  ;;  %v279_v14 = vsel %vm256_vm1, %v597_v13, 0  ;;  %v282_v16 = vsel %vm256_vm1, %v598_v15, 0  ;;  %p608_p13 = pnand %p607_p12, %p746_p4  ;;  %s612_s25 = scalar_lea.vmem %s611_s24, 256 }
  0x1e   : > { %p614_p2 = scmp.lt.s32.totalorder %s612_s25, %s606_s23 }
  0x1f   : > { %p609_p0 = pneg %p608_p13 }
  0x20   : > { %p615_p3 = por %p614_p2, %p613_p1 }
  0x22   : > { %p616_p5 = pnand %p615_p3, %p609_p0 }
  0x24   : > { %515 = vmatpush3.bf16.xpose.msra.mxu0 %v264_v4 }
  0x25   : > { %516 = vmatprep.subr.bf16.mxu0 %v686_v0 }
  0x2c   : > { %517 = vmatpush3.bf16.xpose.msra.mxu0 %v267_v6 }
  0x2d   : > { %518 = vmatprep.subr.bf16.mxu0 %v686_v0 }
  0x34   : > { %519 = vmatpush3.bf16.xpose.msra.mxu0 %v270_v8 }
  0x35   : > { %520 = vmatprep.subr.bf16.mxu0 %v686_v0 }
  0x3c   : > { %521 = vmatpush3.bf16.xpose.msra.mxu0 %v273_v10 }
  0x3d   : > { %522 = vmatprep.subr.bf16.mxu0 %v686_v0 }
  0x44   : > { %523 = vmatpush3.bf16.xpose.msra.mxu0 %v276_v12 }
  0x45   : > { %524 = vmatprep.subr.bf16.mxu0 %v686_v0 }
  0x4c   : > { %525 = vmatpush3.bf16.xpose.msra.mxu0 %v279_v14 }
  0x4d   : > { %526 = vmatprep.subr.bf16.mxu0 %v686_v0 }
  0x54   : > { %527 = vmatpush3.bf16.xpose.msra.mxu0 %v282_v16 }
  0x5b   : > { %529 = vmatmul.mubr.msk.bf16.vlgmr.msra.gmra.mrb[0].mxu0 %vm256_vm1, %v599_v17 }
 0x12e   : > { %v318_v18 = vpop.f32.mrb[0].mxu0 }
 0x12f   : > { %v530_v19 = vpop.f32.mrb[1].mxu0 }
 0x130   : > { %v321_v20 = vpop.f32.mrb[2].mxu0 }
 0x131   : > { %v325_v21 = vmax.f32 %v318_v18, %v321_v20  ;;  %v531_v22 = vpop.f32.mrb[3].mxu0 }
 0x133   : > { %v326_v23 = vrot.slane %v325_v21, 4 }
 0x135   : > { %v327_v24 = vmax.f32 %v325_v21, %v326_v23 }
 0x137   : > { %v328_v25 = vrot.slane %v327_v24, 2 }
 0x139   : > { %v329_v26 = vmax.f32 %v327_v24, %v328_v25 }
 0x13b   : > { %v330_v27 = vrot.slane %v329_v26, 1 }
 0x13d   : > { %v331_v28 = vmax.f32 %v329_v26, %v330_v27 }
 0x13f   : > { %v332_v29 = vsub.f32 %v318_v18, %v331_v28  ;;  %v333_v30 = vsub.f32 %v321_v20, %v331_v28 }
 0x141   : > { %v334_v31 = vmul.f32 1.442695, %v332_v29  ;;  %v336_v32 = vmul.f32 1.442695, %v333_v30 }
 0x143   : > { %600 = vpow2.f32 %v334_v31 }
 0x144   : > { %602 = vpow2.f32 %v336_v32 }
 0x14d   : > { %v601_v33 = vpop.eup %600 }
 0x14e   : > { %v603_v34 = vpop.eup %602 }
 0x14f   : > { %v338_v35 = vadd.f32 %v603_v34, %v601_v33 }
 0x151   : > { %v339_v36 = vrot.slane %v338_v35, 4 }
 0x153   : > { %v340_v37 = vadd.f32 %v339_v36, %v338_v35 }
 0x155   : > { %v341_v38 = vrot.slane %v340_v37, 2 }
 0x157   : > { %v342_v39 = vadd.f32 %v341_v38, %v340_v37 }
 0x159   : > { %v343_v40 = vrot.slane %v342_v39, 1 }
 0x15b   : > { %v344_v41 = vadd.f32 %v343_v40, %v342_v39 }
 0x15d   : > { %604 = vrcp.f32 %v344_v41 }
 0x167   : > { %v605_v42 = vpop.eup %604 }
 0x168   : > { %v346_v43 = vmul.f32 %v605_v42, %v344_v41 }
 0x16a   : > { %v347_v44 = vsub.f32 2.0, %v346_v43 }
 0x16c   : > { %v348_v45 = vmul.f32 %v605_v42, %v347_v44 }
 0x16e   : > { %v349_v46 = vmul.f32 %v601_v33, %v348_v45  ;;  %v350_v47 = vmul.f32 %v603_v34, %v348_v45 }
 0x170   : > { %v501_v48 = vpack.c.bf16 %v350_v47, %v349_v46 }
 0x172   : > { %502 = vst [vmem:[%s176_s7] sm:$0xff] %v501_v48  }
 0x173   : > { %619 = shalt.err (!%p616_p5)
}
 0x174   : > { %s620_s26 = scalar_lea.hbm %s793_s18, 128  ;;  %s624_s29 = scalar_lea.hbm %s845_s2, 256 }
 0x175   : > { %p621_p6 = scmp.ne.s32.totalorder %s793_s18, %s620_s26  ;;  %p625_p10 = scmp.lt.u32.totalorder %s793_s18, %s845_s2 }
 0x176   : > { %p626_p11 = scmp.lt.u32.totalorder %s624_s29, %s620_s26  ;;  %p628_p13 = scmp.lt.u32.totalorder %s620_s26, %s793_s18 }
 0x177   : > { %p622_p7 = pnand %p621_p6, %p746_p4 }
 0x178   : > { %p627_p12 = por %p626_p11, %p625_p10 }
 0x179   : > { %p623_p9 = pneg %p622_p7 }
 0x17a   : > { %p629_p0 = por %p628_p13, %p627_p12 }
 0x17c   : > { %p630_p1 = pnand %p629_p0, %p623_p9 }
 0x17e   : > { %633 = shalt.err (!%p630_p1)
}
 0x17f   : > { %s689_s4 = smov 64   ;;  %s690_s5 = smov 4  }
 0x180   : > { %532 = dma.vmem_to_hbm [thread:$0]  (%p746_p4), %s795_s8, 128, %s793_s18, %s797_s20, %s689_s4, %s689_s4, %s690_s5  }
 0x181 PF: > { %p538_p2 = scmp.ge.s32.totalorder %s684_s14, 2  ;;  %s391_s6 = sand.u32 1, %s664_s9  }
 0x182   : > { %s392_s7 = scalar_lea.sflag [#allocation3], %s391_s6 }
 0x183   : > { %p535_p3 = pnand %p538_p2, %p753_p8 }
 0x185   : > { %659 = dma.done.wait (!%p535_p3), %s392_s7, 128  }
 0x186   : > { %661 = vsyncadd (!%p535_p3), %s392_s7, 4294967168  ;;  %s15_s14 = sadd.s32 1, %s684_s14   ;;  %s848_s9 = smov %s668_s10 }
 0x187   : > { %p12_p5 = scmp.ge.s32.totalorder %s15_s14, 4   ;;  %s849_s10 = smov %s672_s11 }
 0x188   : > { %s850_s11 = smov %s759_s22  ;;  %s851_s12 = smov %s680_s13 }
 0x189   : > { %s852_s13 = smov %s854_s17  ;;  %14 = sbr.rel (!%p12_p5) target bundleno = 4 (0x4), region = 66 }
 0x190   :  { %397 = vsyncpa [#allocation3], 1 }
 0x191   :  { %399 = vsyncpa [#allocation3 + $0x1], 1 }

</bundles_post_ra>
